<compile_context>
chip_gen: v7x
topology: tpu7x:2x2x1
jax: 0.10.0
libtpu: 0.0.40
codegen_flags: <defaults>
</compile_context>

<pallas_src>
import jax
import jax.numpy as jnp
from jax import lax
from jax.experimental import pallas as pl
from jax.experimental.pallas import tpu as pltpu

EPS = 1e-5
LANE = 128
TM_CAP = 512                    # v7x-safe row tile; raise to 1024 on v5e/v6e (128 MiB VMEM)
VMEM_LIMIT = 48 * 1024 * 1024   # fits v7x's 64 MiB; raise to ~96 MiB on v5e/v6e with tm=1024
_DTYPE_BYTES = {jnp.bfloat16: 2, jnp.float32: 4}


def _round_up(x, m):
    return ((x + m - 1) // m) * m


def _pick_tm(m):
    # Multiple of 16 (bf16 sublane packing).  Capped so double/triple-buffered
    # A tiles + pinned W + bf16 Z tiles stay well inside v7x's 64 MiB VMEM.
    return min(TM_CAP, _round_up(m, 16))


# ----------------------------- Pallas kernels ------------------------------

def _matmul_stats_kernel(a_ref, w_ref, z_ref, sum_ref, sq_ref):
    """One row tile of Z = A @ W plus per-tile per-channel sum / sum-of-squares.

    The grid axis is "parallel", so statistics are per-tile partials: each tile
    writes its own (8, C) block (rows replicated for (8,128) tiling) and the
    tiny reduction over tiles happens in plain JAX.  Z is stored in bf16; the
    stats are accumulated in f32 from the bf16-rounded values so pass 2
    normalizes exactly the values the statistics describe.  Zero-padded rows
    of A contribute exactly 0 to both sums.
    """
    zf = jnp.dot(a_ref[...], w_ref[...], preferred_element_type=jnp.float32)
    zb = zf.astype(z_ref.dtype)
    z_ref[...] = zb
    z = zb.astype(jnp.float32)
    sum_ref[...] = jnp.broadcast_to(jnp.sum(z, axis=0, keepdims=True), sum_ref.shape)
    sq_ref[...] = jnp.broadcast_to(jnp.sum(z * z, axis=0, keepdims=True), sq_ref.shape)


def _bn_relu_kernel(z_ref, scale_ref, shift_ref, o_ref):
    # y = relu(z * scale + shift); scale/shift fold mean/var/gamma/beta.
    y = z_ref[...].astype(jnp.float32) * scale_ref[...] + shift_ref[...]
    o_ref[...] = jnp.maximum(y, 0.0).astype(o_ref.dtype)


def _bn_add_relu_kernel(z_ref, s_ref, scr_ref, shr_ref, scs_ref, shs_ref, o_ref):
    # out = relu((z2*scale2 + shift2) + (zs*scale_s + shift_s))   (projection)
    r = z_ref[...].astype(jnp.float32) * scr_ref[...] + shr_ref[...]
    s = s_ref[...].astype(jnp.float32) * scs_ref[...] + shs_ref[...]
    o_ref[...] = jnp.maximum(r + s, 0.0).astype(o_ref.dtype)


def _add_identity_relu_kernel(z_ref, s_ref, scale_ref, shift_ref, o_ref):
    # out = relu((z2*scale2 + shift2) + x)   (identity shortcut, no extra FMAs)
    r = z_ref[...].astype(jnp.float32) * scale_ref[...] + shift_ref[...]
    o_ref[...] = jnp.maximum(r + s_ref[...].astype(jnp.float32), 0.0).astype(o_ref.dtype)


# --------------------------- pallas_call wrappers ---------------------------

def _a_row_spec(tm, k_pad, n_tiles):
    """Row-tile spec for A; triple-buffered when the grid is deep enough."""
    index_map = lambda i: (i, 0)
    if n_tiles >= 3:
        try:
            return pl.BlockSpec((tm, k_pad), index_map,
                                pipeline_mode=pl.Buffered(3))
        except Exception:  # fall back on jax versions without pipeline_mode
            pass
    return pl.BlockSpec((tm, k_pad), index_map)


def _conv_matmul_stats(a, w_mat, c_pad, tm):
    """Row-tiled Z = A @ W (bf16 in, f32 accum, bf16 out) + per-channel stats."""
    m, k = a.shape
    m_pad = _round_up(m, tm)
    k_pad = _round_up(k, LANE)                   # lane-dense A / full MXU depth
    a_p = jnp.pad(a.astype(jnp.bfloat16), ((0, m_pad - m), (0, k_pad - k)))
    w_p = jnp.pad(w_mat.astype(jnp.bfloat16),
                  ((0, k_pad - k), (0, c_pad - w_mat.shape[1])))
    nt = m_pad // tm
    flops = 2 * m_pad * k_pad * c_pad
    bytes_accessed = (m_pad * k_pad * 2 + k_pad * c_pad * 2
                      + m_pad * c_pad * 2 + 2 * nt * 8 * c_pad * 4)

    z, s, q = pl.pallas_call(
        _matmul_stats_kernel,
        out_shape=(jax.ShapeDtypeStruct((m_pad, c_pad), jnp.bfloat16),
                   jax.ShapeDtypeStruct((nt * 8, c_pad), jnp.float32),
                   jax.ShapeDtypeStruct((nt * 8, c_pad), jnp.float32)),
        grid_spec=pltpu.PrefetchScalarGridSpec(
            num_scalar_prefetch=0,
            grid=(nt,),
            in_specs=[
                _a_row_spec(tm, k_pad, nt),                   # row tile of A
                pl.BlockSpec((k_pad, c_pad), lambda i: (0, 0)),  # W pinned
            ],
            out_specs=(
                pl.BlockSpec((tm, c_pad), lambda i: (i, 0)),  # Z row tile (bf16)
                pl.BlockSpec((8, c_pad), lambda i: (i, 0)),   # per-tile sum
                pl.BlockSpec((8, c_pad), lambda i: (i, 0)),   # per-tile sumsq
            )),
        compiler_params=pltpu.CompilerParams(
            dimension_semantics=("parallel",),   # shards tiles over v7x's 2 TCs
            vmem_limit_bytes=VMEM_LIMIT),
        cost_estimate=pl.CostEstimate(flops=flops, transcendentals=0,
                                      bytes_accessed=bytes_accessed),
    )(a_p, w_p)
    # Reduce the tiny per-tile partials (rows within a tile are replicated).
    sum_c = s[0::8].sum(axis=0)
    sq_c = q[0::8].sum(axis=0)
    return z, sum_c, sq_c, m_pad


def _bn_relu(z, scale, shift, tm, out_dtype):
    m_pad, c_pad = z.shape
    ob = _DTYPE_BYTES.get(out_dtype, 4)
    return pl.pallas_call(
        _bn_relu_kernel,
        out_shape=jax.ShapeDtypeStruct((m_pad, c_pad), out_dtype),
        grid_spec=pltpu.PrefetchScalarGridSpec(
            num_scalar_prefetch=0,
            grid=(m_pad // tm,),
            in_specs=[
                pl.BlockSpec((tm, c_pad), lambda i: (i, 0)),
                pl.BlockSpec((1, c_pad), lambda i: (0, 0)),
                pl.BlockSpec((1, c_pad), lambda i: (0, 0)),
            ],
            out_specs=pl.BlockSpec((tm, c_pad), lambda i: (i, 0))),
        compiler_params=pltpu.CompilerParams(
            dimension_semantics=("parallel",),
            vmem_limit_bytes=VMEM_LIMIT),
        cost_estimate=pl.CostEstimate(
            flops=3 * m_pad * c_pad, transcendentals=0,
            bytes_accessed=m_pad * c_pad * (2 + ob) + 2 * c_pad * 4),
    )(z, scale, shift)


def _bn_add_relu(z, s_in, scale_r, shift_r, scale_s, shift_s, tm):
    m_pad, c_pad = z.shape
    return pl.pallas_call(
        _bn_add_relu_kernel,
        out_shape=jax.ShapeDtypeStruct((m_pad, c_pad), jnp.float32),
        grid_spec=pltpu.PrefetchScalarGridSpec(
            num_scalar_prefetch=0,
            grid=(m_pad // tm,),
            in_specs=[
                pl.BlockSpec((tm, c_pad), lambda i: (i, 0)),
                pl.BlockSpec((tm, c_pad), lambda i: (i, 0)),
                pl.BlockSpec((1, c_pad), lambda i: (0, 0)),
                pl.BlockSpec((1, c_pad), lambda i: (0, 0)),
                pl.BlockSpec((1, c_pad), lambda i: (0, 0)),
                pl.BlockSpec((1, c_pad), lambda i: (0, 0)),
            ],
            out_specs=pl.BlockSpec((tm, c_pad), lambda i: (i, 0))),
        compiler_params=pltpu.CompilerParams(
            dimension_semantics=("parallel",),
            vmem_limit_bytes=VMEM_LIMIT),
        cost_estimate=pl.CostEstimate(
            flops=6 * m_pad * c_pad, transcendentals=0,
            bytes_accessed=m_pad * c_pad * (2 + 2 + 4) + 4 * c_pad * 4),
    )(z, s_in, scale_r, shift_r, scale_s, shift_s)


def _add_identity_relu(z, s_in, scale, shift, tm):
    m_pad, c_pad = z.shape
    return pl.pallas_call(
        _add_identity_relu_kernel,
        out_shape=jax.ShapeDtypeStruct((m_pad, c_pad), jnp.float32),
        grid_spec=pltpu.PrefetchScalarGridSpec(
            num_scalar_prefetch=0,
            grid=(m_pad // tm,),
            in_specs=[
                pl.BlockSpec((tm, c_pad), lambda i: (i, 0)),
                pl.BlockSpec((tm, c_pad), lambda i: (i, 0)),
                pl.BlockSpec((1, c_pad), lambda i: (0, 0)),
                pl.BlockSpec((1, c_pad), lambda i: (0, 0)),
            ],
            out_specs=pl.BlockSpec((tm, c_pad), lambda i: (i, 0))),
        compiler_params=pltpu.CompilerParams(
            dimension_semantics=("parallel",),
            vmem_limit_bytes=VMEM_LIMIT),
        cost_estimate=pl.CostEstimate(
            flops=4 * m_pad * c_pad, transcendentals=0,
            bytes_accessed=m_pad * c_pad * (2 + 2 + 4) + 2 * c_pad * 4),
    )(z, s_in, scale, shift)


# ------------------------------- JAX glue ----------------------------------

def _im2col(x_nhwc, ksize, stride, padding):
    # Built in bf16 to halve the HBM footprint of the expanded matrix.
    n, h, w, c = x_nhwc.shape
    xp = jnp.pad(x_nhwc, ((0, 0), (padding, padding), (padding, padding), (0, 0)))
    ho = (h + 2 * padding - ksize) // stride + 1
    wo = (w + 2 * padding - ksize) // stride + 1
    cols = []
    for kh in range(ksize):
        for kw in range(ksize):
            cols.append(xp[:, kh:kh + stride * (ho - 1) + 1:stride,
                           kw:kw + stride * (wo - 1) + 1:stride, :])
    a = jnp.concatenate(cols, axis=-1)            # (N, Ho, Wo, k*k*C)
    return a.reshape(n * ho * wo, ksize * ksize * c), ho, wo


def _w_mat(w_oihw):
    # (Cout, Cin, kh, kw) -> (kh*kw*Cin, Cout), matching im2col column order.
    co, ci, kh, kw = w_oihw.shape
    return jnp.transpose(w_oihw, (2, 3, 1, 0)).reshape(kh * kw * ci, co)


def _bn_scale_shift(sum_c, sq_c, count, gamma, beta, c_pad):
    # Training-mode batch stats, biased variance, eps = 1e-5 (f32 throughout).
    # TODO(synk): switch to a Welford-style combine of the per-tile partials to
    # avoid E[z^2]-E[z]^2 cancellation for very large M / large activations.
    mean = sum_c / count
    var = jnp.maximum(sq_c / count - mean * mean, 0.0)
    g = jnp.pad(gamma.astype(jnp.float32), (0, c_pad - gamma.shape[0]))
    b = jnp.pad(beta.astype(jnp.float32), (0, c_pad - beta.shape[0]))
    scale = g * lax.rsqrt(var + EPS)
    shift = b - mean * scale
    return scale.reshape(1, c_pad), shift.reshape(1, c_pad)


def basic_block_forward(x_nchw, params, stride):
    n, c_in, h, w = x_nchw.shape
    c1 = params['w1'].shape[0]                    # BasicBlock.expansion == 1
    c_pad = _round_up(c1, LANE)                   # lane-dense output channels
    # NCHW -> NHWC and a single bf16 cast (the MXU consumes bf16 operands).
    x = jnp.transpose(x_nchw, (0, 2, 3, 1)).astype(jnp.bfloat16)

    # residual conv1: 3x3, stride=stride, pad=1 -> BN1 (batch stats) -> ReLU
    a1, ho, wo = _im2col(x, 3, stride, 1)
    m = n * ho * wo
    tm = _pick_tm(m)
    z1, s1, q1, m_pad = _conv_matmul_stats(a1, _w_mat(params['w1']), c_pad, tm)
    sc1, sh1 = _bn_scale_shift(s1, q1, m, params['g1'], params['b1'], c_pad)
    y1 = _bn_relu(z1, sc1, sh1, tm, jnp.bfloat16)  # y1 kept in bf16

    # residual conv2: 3x3, stride=1, pad=1 -> BN2 (stats only, applied below)
    # TODO(synk): fold this im2col into the conv2 kernel (load y1/z1 row tiles
    # with halo once, form the 9 shifted views in VMEM, fuse BN1+ReLU) so y1
    # and a2 never round-trip HBM (removes the 9x expansion).
    y1_nhwc = y1[:m, :c1].reshape(n, ho, wo, c1)
    a2, _, _ = _im2col(y1_nhwc, 3, 1, 1)
    z2, s2, q2, _ = _conv_matmul_stats(a2, _w_mat(params['w2']), c_pad, tm)
    sc2, sh2 = _bn_scale_shift(s2, q2, m, params['g2'], params['b2'], c_pad)

    if stride != 1 or c_in != c1:
        # projection shortcut: 1x1 conv + BN, fused into the add/ReLU pass
        a_s, _, _ = _im2col(x, 1, stride, 0)
        zs, ss, qs, _ = _conv_matmul_stats(a_s, _w_mat(params['ws']), c_pad, tm)
        scs, shs = _bn_scale_shift(ss, qs, m, params['gs'], params['bs'], c_pad)
        out = _bn_add_relu(z2, zs, sc2, sh2, scs, shs, tm)
    else:
        # identity shortcut: bf16 x stream + dedicated kernel (no scale/shift
        # FMAs).  Channels still zero-padded to c_pad for lane-aligned blocks;
        # for real layers c1 is (a multiple of) 128 so the waste is small.
        s_in = jnp.pad(x.reshape(m, c_in), ((0, m_pad - m), (0, c_pad - c_in)))
        out = _add_identity_relu(z2, s_in, sc2, sh2, tm)

    out = out[:m, :c1].reshape(n, ho, wo, c1)
    return jnp.transpose(out, (0, 3, 1, 2)).astype(jnp.float32)  # NHWC -> NCHW


# -------------------------- reference & params ------------------------------

def reference_forward(x_nchw, params, stride):
    # Mirrors the kernel numerics: bf16 conv operands, f32 accumulation, bf16
    # Z / y1 / shortcut intermediates, BN / residual / ReLU in f32,
    # training-mode batch statistics.
    def conv(x, w_oihw, stride, padding):
        w_hwio = jnp.transpose(w_oihw, (2, 3, 1, 0))
        z = lax.conv_general_dilated(
            x.astype(jnp.bfloat16), w_hwio.astype(jnp.bfloat16),
            window_strides=(stride, stride),
            padding=((padding, padding), (padding, padding)),
            dimension_numbers=('NHWC', 'HWIO', 'NHWC'),
            preferred_element_type=jnp.float32)
        return z.astype(jnp.bfloat16).astype(jnp.float32)  # kernel stores Z in bf16

    def bn(z, gamma, beta):
        mean = jnp.mean(z, axis=(0, 1, 2), keepdims=True)
        var = jnp.mean((z - mean) ** 2, axis=(0, 1, 2), keepdims=True)
        return (z - mean) * lax.rsqrt(var + EPS) * gamma + beta

    x = jnp.transpose(x_nchw, (0, 2, 3, 1)).astype(jnp.float32)
    c_in = x.shape[-1]
    c1 = params['w1'].shape[0]
    y = jax.nn.relu(bn(conv(x, params['w1'], stride, 1),
                       params['g1'], params['b1']))
    y = y.astype(jnp.bfloat16).astype(jnp.float32)   # kernel stores y1 in bf16
    y = bn(conv(y, params['w2'], 1, 1), params['g2'], params['b2'])
    if stride != 1 or c_in != c1:
        s = bn(conv(x, params['ws'], stride, 0), params['gs'], params['bs'])
    else:
        s = x.astype(jnp.bfloat16).astype(jnp.float32)  # kernel reads x in bf16
    return jnp.transpose(jax.nn.relu(y + s), (0, 3, 1, 2))


def init_params(key, in_channels, out_channels, stride):
    c1 = out_channels  # BasicBlock.expansion == 1
    k = jax.random.split(key, 7)
    p = {
        'w1': 0.1 * jax.random.normal(k[0], (c1, in_channels, 3, 3), jnp.float32),
        'g1': 1.0 + 0.1 * jax.random.normal(k[1], (c1,), jnp.float32),
        'b1': 0.1 * jax.random.normal(k[2], (c1,), jnp.float32),
        'w2': 0.1 * jax.random.normal(k[3], (c1, c1, 3, 3), jnp.float32),
        'g2': 1.0 + 0.1 * jax.random.normal(k[4], (c1,), jnp.float32),
        'b2': 0.1 * jax.random.normal(k[5], (c1,), jnp.float32),
    }
    if stride != 1 or in_channels != c1:
        p['ws'] = 0.1 * jax.random.normal(k[6], (c1, in_channels, 1, 1), jnp.float32)
        p['gs'] = jnp.ones((c1,), jnp.float32)
        p['bs'] = jnp.zeros((c1,), jnp.float32)
    return p


if __name__ == "__main__":
    key = jax.random.PRNGKey(0)
    kx1, kp1, kx2, kp2 = jax.random.split(key, 4)

    fwd = jax.jit(basic_block_forward, static_argnums=(2,))

    # Config A: projection shortcut (in=4, out=8, stride=2), x: (2, 4, 16, 16)
    x1 = jax.random.normal(kx1, (2, 4, 16, 16), jnp.float32)
    p1 = init_params(kp1, 4, 8, 2)
    out1 = fwd(x1, p1, 2)
    jax.block_until_ready(out1)
    ref1 = reference_forward(x1, p1, 2)
    assert out1.shape == (2, 8, 8, 8), out1.shape
    assert jnp.allclose(out1, ref1, atol=2e-2, rtol=2e-2), float(
        jnp.max(jnp.abs(out1 - ref1)))

    # Config B: identity shortcut (in=out=8, stride=1), x: (4, 8, 16, 16)
    # M = 1024 with the 512-row tile -> exercises the multi-tile parallel
    # statistics path and the dedicated identity-shortcut kernel.
    x2 = jax.random.normal(kx2, (4, 8, 16, 16), jnp.float32)
    p2 = init_params(kp2, 8, 8, 1)
    out2 = fwd(x2, p2, 1)
    jax.block_until_ready(out2)
    ref2 = reference_forward(x2, p2, 1)
    assert out2.shape == (4, 8, 16, 16), out2.shape
    assert jnp.allclose(out2, ref2, atol=2e-2, rtol=2e-2), float(
        jnp.max(jnp.abs(out2 - ref2)))

    print("KERNEL_OK")
</pallas_src>

<mosaic_0001>
module attributes {stable_mosaic.version = 11 : i64} {
  func.func @_matmul_stats_kernel(%arg0: i32, %arg1: memref<128x128xbf16, #tpu.memory_space<vmem>>, %arg2: memref<128x128xbf16, #tpu.memory_space<vmem>>, %arg3: memref<128x128xbf16, #tpu.memory_space<vmem>>, %arg4: memref<8x128xf32, #tpu.memory_space<vmem>>, %arg5: memref<8x128xf32, #tpu.memory_space<vmem>>) attributes {dimension_semantics = [#tpu.dimension_semantics<parallel>], iteration_bounds = array<i64: 1>, scalar_prefetch = 0 : i64, scratch_operands = 0 : i64, tpu.core_type = #tpu.core_type<tc>, window_params = [{transform_indices = @transform_0, window_bounds = array<i64: 128, 128>}, {pipeline_mode = #tpu.pipeline_mode<synchronous>, transform_indices = @transform_1, window_bounds = array<i64: 128, 128>}, {transform_indices = @transform_2, window_bounds = array<i64: 128, 128>}, {transform_indices = @transform_3, window_bounds = array<i64: 8, 128>}, {transform_indices = @transform_4, window_bounds = array<i64: 8, 128>}]} {
    %c0 = arith.constant 0 : index
    %c0_0 = arith.constant 0 : index
    %0 = vector.load %arg1[%c0, %c0_0] : memref<128x128xbf16, #tpu.memory_space<vmem>>, vector<128x128xbf16>
    %c0_1 = arith.constant 0 : index
    %c0_2 = arith.constant 0 : index
    %1 = vector.load %arg2[%c0_1, %c0_2] : memref<128x128xbf16, #tpu.memory_space<vmem>>, vector<128x128xbf16>
    %cst = arith.constant dense<0.000000e+00> : vector<128x128xf32>
    %2 = tpu.matmul %0, %1, %cst {dimension_numbers = #tpu.dot_dimension_numbers<[1], [0], [0], [1], [0, 0, 1, 1], [], []>} : vector<128x128xbf16>, vector<128x128xbf16>, vector<128x128xf32> -> vector<128x128xf32>
    %3 = arith.truncf %2 : vector<128x128xf32> to vector<128x128xbf16>
    %c0_3 = arith.constant 0 : index
    %c0_4 = arith.constant 0 : index
    %4 = vector.load %arg3[%c0_3, %c0_4] : memref<128x128xbf16, #tpu.memory_space<vmem>>, vector<128x128xbf16>
    tpu.vector_store %arg3[%c0_3, %c0_4], %3 {strides = array<i32>} : memref<128x128xbf16, #tpu.memory_space<vmem>>, vector<128x128xbf16>,
    %5 = arith.extf %3 : vector<128x128xbf16> to vector<128x128xf32>
    %cst_5 = arith.constant dense<0.000000e+00> : vector<128xf32>
    %6 = vector.multi_reduction <add>, %5, %cst_5 [0] : vector<128x128xf32> to vector<128xf32>
    %7 = vector.shape_cast %6 : vector<128xf32> to vector<1x128xf32>
    %8 = vector.shape_cast %7 : vector<1x128xf32> to vector<1x128xf32>
    %9 = vector.broadcast %8 : vector<1x128xf32> to vector<8x128xf32>
    %c0_6 = arith.constant 0 : index
    %c0_7 = arith.constant 0 : index
    %10 = vector.load %arg4[%c0_6, %c0_7] : memref<8x128xf32, #tpu.memory_space<vmem>>, vector<8x128xf32>
    tpu.vector_store %arg4[%c0_6, %c0_7], %9 {strides = array<i32>} : memref<8x128xf32, #tpu.memory_space<vmem>>, vector<8x128xf32>,
    %11 = arith.mulf %5, %5 : vector<128x128xf32>
    %cst_8 = arith.constant dense<0.000000e+00> : vector<128xf32>
    %12 = vector.multi_reduction <add>, %11, %cst_8 [0] : vector<128x128xf32> to vector<128xf32>
    %13 = vector.shape_cast %12 : vector<128xf32> to vector<1x128xf32>
    %14 = vector.shape_cast %13 : vector<1x128xf32> to vector<1x128xf32>
    %15 = vector.broadcast %14 : vector<1x128xf32> to vector<8x128xf32>
    %c0_9 = arith.constant 0 : index
    %c0_10 = arith.constant 0 : index
    %16 = vector.load %arg5[%c0_9, %c0_10] : memref<8x128xf32, #tpu.memory_space<vmem>>, vector<8x128xf32>
    tpu.vector_store %arg5[%c0_9, %c0_10], %15 {strides = array<i32>} : memref<8x128xf32, #tpu.memory_space<vmem>>, vector<8x128xf32>,
    return
  }
  func.func @transform_0(%arg0: i32) -> (i32, i32) {
    %c0_i32 = arith.constant 0 : i32
    %c0_i32_0 = arith.constant 0 : i32
    return %arg0, %c0_i32 : i32, i32
  }
  func.func @transform_1(%arg0: i32) -> (i32, i32) {
    %c0_i32 = arith.constant 0 : i32
    %c0_i32_0 = arith.constant 0 : i32
    %c0_i32_1 = arith.constant 0 : i32
    return %c0_i32, %c0_i32_0 : i32, i32
  }
  func.func @transform_2(%arg0: i32) -> (i32, i32) {
    %c0_i32 = arith.constant 0 : i32
    %c0_i32_0 = arith.constant 0 : i32
    return %arg0, %c0_i32 : i32, i32
  }
  func.func @transform_3(%arg0: i32) -> (i32, i32) {
    %c0_i32 = arith.constant 0 : i32
    %c0_i32_0 = arith.constant 0 : i32
    return %arg0, %c0_i32 : i32, i32
  }
  func.func @transform_4(%arg0: i32) -> (i32, i32) {
    %c0_i32 = arith.constant 0 : i32
    %c0_i32_0 = arith.constant 0 : i32
    return %arg0, %c0_i32 : i32, i32
  }
}

module attributes {stable_mosaic.version = 11 : i64} {
  func.func @_bn_relu_kernel(%arg0: i32, %arg1: memref<128x128xbf16, #tpu.memory_space<vmem>>, %arg2: memref<1x128xf32, #tpu.memory_space<vmem>>, %arg3: memref<1x128xf32, #tpu.memory_space<vmem>>, %arg4: memref<128x128xbf16, #tpu.memory_space<vmem>>) attributes {dimension_semantics = [#tpu.dimension_semantics<parallel>], iteration_bounds = array<i64: 1>, scalar_prefetch = 0 : i64, scratch_operands = 0 : i64, tpu.core_type = #tpu.core_type<tc>, window_params = [{transform_indices = @transform_0, window_bounds = array<i64: 128, 128>}, {pipeline_mode = #tpu.pipeline_mode<synchronous>, transform_indices = @transform_1, window_bounds = array<i64: 1, 128>}, {pipeline_mode = #tpu.pipeline_mode<synchronous>, transform_indices = @transform_2, window_bounds = array<i64: 1, 128>}, {transform_indices = @transform_3, window_bounds = array<i64: 128, 128>}]} {
    %c0 = arith.constant 0 : index
    %c0_0 = arith.constant 0 : index
    %0 = vector.load %arg1[%c0, %c0_0] : memref<128x128xbf16, #tpu.memory_space<vmem>>, vector<128x128xbf16>
    %1 = arith.extf %0 : vector<128x128xbf16> to vector<128x128xf32>
    %c0_1 = arith.constant 0 : index
    %c0_2 = arith.constant 0 : index
    %2 = vector.load %arg2[%c0_1, %c0_2] : memref<1x128xf32, #tpu.memory_space<vmem>>, vector<1x128xf32>
    %3 = vector.broadcast %2 : vector<1x128xf32> to vector<128x128xf32>
    %4 = arith.mulf %1, %3 : vector<128x128xf32>
    %c0_3 = arith.constant 0 : index
    %c0_4 = arith.constant 0 : index
    %5 = vector.load %arg3[%c0_3, %c0_4] : memref<1x128xf32, #tpu.memory_space<vmem>>, vector<1x128xf32>
    %6 = vector.broadcast %5 : vector<1x128xf32> to vector<128x128xf32>
    %7 = arith.addf %4, %6 : vector<128x128xf32>
    %cst = arith.constant 0.000000e+00 : f32
    %8 = vector.broadcast %cst : f32 to vector<128x128xf32>
    %9 = arith.maximumf %7, %8 : vector<128x128xf32>
    %10 = arith.truncf %9 : vector<128x128xf32> to vector<128x128xbf16>
    %c0_5 = arith.constant 0 : index
    %c0_6 = arith.constant 0 : index
    %11 = vector.load %arg4[%c0_5, %c0_6] : memref<128x128xbf16, #tpu.memory_space<vmem>>, vector<128x128xbf16>
    tpu.vector_store %arg4[%c0_5, %c0_6], %10 {strides = array<i32>} : memref<128x128xbf16, #tpu.memory_space<vmem>>, vector<128x128xbf16>,
    return
  }
  func.func @transform_0(%arg0: i32) -> (i32, i32) {
    %c0_i32 = arith.constant 0 : i32
    %c0_i32_0 = arith.constant 0 : i32
    return %arg0, %c0_i32 : i32, i32
  }
  func.func @transform_1(%arg0: i32) -> (i32, i32) {
    %c0_i32 = arith.constant 0 : i32
    %c0_i32_0 = arith.constant 0 : i32
    %c0_i32_1 = arith.constant 0 : i32
    return %c0_i32, %c0_i32_0 : i32, i32
  }
  func.func @transform_2(%arg0: i32) -> (i32, i32) {
    %c0_i32 = arith.constant 0 : i32
    %c0_i32_0 = arith.constant 0 : i32
    %c0_i32_1 = arith.constant 0 : i32
    return %c0_i32, %c0_i32_0 : i32, i32
  }
  func.func @transform_3(%arg0: i32) -> (i32, i32) {
    %c0_i32 = arith.constant 0 : i32
    %c0_i32_0 = arith.constant 0 : i32
    return %arg0, %c0_i32 : i32, i32
  }
}

module attributes {stable_mosaic.version = 11 : i64} {
  func.func @_bn_add_relu_kernel(%arg0: i32, %arg1: memref<128x128xbf16, #tpu.memory_space<vmem>>, %arg2: memref<128x128xbf16, #tpu.memory_space<vmem>>, %arg3: memref<1x128xf32, #tpu.memory_space<vmem>>, %arg4: memref<1x128xf32, #tpu.memory_space<vmem>>, %arg5: memref<1x128xf32, #tpu.memory_space<vmem>>, %arg6: memref<1x128xf32, #tpu.memory_space<vmem>>, %arg7: memref<128x128xf32, #tpu.memory_space<vmem>>) attributes {dimension_semantics = [#tpu.dimension_semantics<parallel>], iteration_bounds = array<i64: 1>, scalar_prefetch = 0 : i64, scratch_operands = 0 : i64, tpu.core_type = #tpu.core_type<tc>, window_params = [{transform_indices = @transform_0, window_bounds = array<i64: 128, 128>}, {transform_indices = @transform_1, window_bounds = array<i64: 128, 128>}, {pipeline_mode = #tpu.pipeline_mode<synchronous>, transform_indices = @transform_2, window_bounds = array<i64: 1, 128>}, {pipeline_mode = #tpu.pipeline_mode<synchronous>, transform_indices = @transform_3, window_bounds = array<i64: 1, 128>}, {pipeline_mode = #tpu.pipeline_mode<synchronous>, transform_indices = @transform_4, window_bounds = array<i64: 1, 128>}, {pipeline_mode = #tpu.pipeline_mode<synchronous>, transform_indices = @transform_5, window_bounds = array<i64: 1, 128>}, {transform_indices = @transform_6, window_bounds = array<i64: 128, 128>}]} {
    %c0 = arith.constant 0 : index
    %c0_0 = arith.constant 0 : index
    %0 = vector.load %arg1[%c0, %c0_0] : memref<128x128xbf16, #tpu.memory_space<vmem>>, vector<128x128xbf16>
    %1 = arith.extf %0 : vector<128x128xbf16> to vector<128x128xf32>
    %c0_1 = arith.constant 0 : index
    %c0_2 = arith.constant 0 : index
    %2 = vector.load %arg3[%c0_1, %c0_2] : memref<1x128xf32, #tpu.memory_space<vmem>>, vector<1x128xf32>
    %3 = vector.broadcast %2 : vector<1x128xf32> to vector<128x128xf32>
    %4 = arith.mulf %1, %3 : vector<128x128xf32>
    %c0_3 = arith.constant 0 : index
    %c0_4 = arith.constant 0 : index
    %5 = vector.load %arg4[%c0_3, %c0_4] : memref<1x128xf32, #tpu.memory_space<vmem>>, vector<1x128xf32>
    %6 = vector.broadcast %5 : vector<1x128xf32> to vector<128x128xf32>
    %7 = arith.addf %4, %6 : vector<128x128xf32>
    %c0_5 = arith.constant 0 : index
    %c0_6 = arith.constant 0 : index
    %8 = vector.load %arg2[%c0_5, %c0_6] : memref<128x128xbf16, #tpu.memory_space<vmem>>, vector<128x128xbf16>
    %9 = arith.extf %8 : vector<128x128xbf16> to vector<128x128xf32>
    %c0_7 = arith.constant 0 : index
    %c0_8 = arith.constant 0 : index
    %10 = vector.load %arg5[%c0_7, %c0_8] : memref<1x128xf32, #tpu.memory_space<vmem>>, vector<1x128xf32>
    %11 = vector.broadcast %10 : vector<1x128xf32> to vector<128x128xf32>
    %12 = arith.mulf %9, %11 : vector<128x128xf32>
    %c0_9 = arith.constant 0 : index
    %c0_10 = arith.constant 0 : index
    %13 = vector.load %arg6[%c0_9, %c0_10] : memref<1x128xf32, #tpu.memory_space<vmem>>, vector<1x128xf32>
    %14 = vector.broadcast %13 : vector<1x128xf32> to vector<128x128xf32>
    %15 = arith.addf %12, %14 : vector<128x128xf32>
    %16 = arith.addf %7, %15 : vector<128x128xf32>
    %cst = arith.constant 0.000000e+00 : f32
    %17 = vector.broadcast %cst : f32 to vector<128x128xf32>
    %18 = arith.maximumf %16, %17 : vector<128x128xf32>
    %c0_11 = arith.constant 0 : index
    %c0_12 = arith.constant 0 : index
    %19 = vector.load %arg7[%c0_11, %c0_12] : memref<128x128xf32, #tpu.memory_space<vmem>>, vector<128x128xf32>
    tpu.vector_store %arg7[%c0_11, %c0_12], %18 {strides = array<i32>} : memref<128x128xf32, #tpu.memory_space<vmem>>, vector<128x128xf32>,
    return
  }
  func.func @transform_0(%arg0: i32) -> (i32, i32) {
    %c0_i32 = arith.constant 0 : i32
    %c0_i32_0 = arith.constant 0 : i32
    return %arg0, %c0_i32 : i32, i32
  }
  func.func @transform_1(%arg0: i32) -> (i32, i32) {
    %c0_i32 = arith.constant 0 : i32
    %c0_i32_0 = arith.constant 0 : i32
    return %arg0, %c0_i32 : i32, i32
  }
  func.func @transform_2(%arg0: i32) -> (i32, i32) {
    %c0_i32 = arith.constant 0 : i32
    %c0_i32_0 = arith.constant 0 : i32
    %c0_i32_1 = arith.constant 0 : i32
    return %c0_i32, %c0_i32_0 : i32, i32
  }
  func.func @transform_3(%arg0: i32) -> (i32, i32) {
    %c0_i32 = arith.constant 0 : i32
    %c0_i32_0 = arith.constant 0 : i32
    %c0_i32_1 = arith.constant 0 : i32
    return %c0_i32, %c0_i32_0 : i32, i32
  }
  func.func @transform_4(%arg0: i32) -> (i32, i32) {
    %c0_i32 = arith.constant 0 : i32
    %c0_i32_0 = arith.constant 0 : i32
    %c0_i32_1 = arith.constant 0 : i32
    return %c0_i32, %c0_i32_0 : i32, i32
  }
  func.func @transform_5(%arg0: i32) -> (i32, i32) {
    %c0_i32 = arith.constant 0 : i32
    %c0_i32_0 = arith.constant 0 : i32
    %c0_i32_1 = arith.constant 0 : i32
    return %c0_i32, %c0_i32_0 : i32, i32
  }
  func.func @transform_6(%arg0: i32) -> (i32, i32) {
    %c0_i32 = arith.constant 0 : i32
    %c0_i32_0 = arith.constant 0 : i32
    return %arg0, %c0_i32 : i32, i32
  }
}

</mosaic_0001>

<bundles_post_ra>
// kernel: basic_block_forward.6
= control target key start
LH: loop header
LB: loop body
LE: loop exit
PB: predicated region body
PF: predicated region fallthrough
CT: control target
= control target key end

     0   :  { %s422_s0 = inlined_call_operand.vmem [shape: bf16[128,128], index: 0, kind: input, shape index: {}]   ;;  %s423_s1 = inlined_call_operand.vmem [shape: f32[1,128], index: 1, kind: input, shape index: {}]   ;;  %s424_s2 = inlined_call_operand.vmem [shape: f32[1,128], index: 2, kind: input, shape index: {}]   ;;  %s425_s3 = inlined_call_operand.vmem [shape: bf16[128,128], index: 3, kind: output, shape index: {}]  }
   0x1   :  { %v227_v0 = vld [vmem:[%s422_s0] sm:$0xff]   ;;  %v298_v4 = vld [vmem:[%s422_s0 + $0x8] sm:$0xff]   ;;  %v299_v5 = vld [vmem:[%s422_s0 + $0x10] sm:$0xff]  }
   0x2   :  { %v338_v1 = vld [vmem:[%s423_s1] ss:$0 sm:$0xff]  ;;  %v228_v2 = vunpack.c.l.bf16 %v227_v0  ;;  %v229_v3 = vunpack.c.h.bf16 %v227_v0  ;;  %v300_v6 = vld [vmem:[%s422_s0 + $0x18] sm:$0xff]   ;;  %v232_v8 = vunpack.c.l.bf16 %v298_v4  ;;  %v233_v9 = vunpack.c.h.bf16 %v298_v4  ;;  %v302_v33 = vld [vmem:[%s422_s0 + $0x28] sm:$0xff]  }
   0x3   :  { %v352_v7 = vld [vmem:[%s424_s2] ss:$0 sm:$0xff]  ;;  %v236_v10 = vunpack.c.l.bf16 %v299_v5  ;;  %v237_v11 = vunpack.c.h.bf16 %v299_v5  ;;  %v240_v14 = vunpack.c.l.bf16 %v300_v6  ;;  %v241_v15 = vunpack.c.h.bf16 %v300_v6  ;;  %v303_v38 = vld [vmem:[%s422_s0 + $0x30] sm:$0xff]   ;;  %v304_v43 = vld [vmem:[%s422_s0 + $0x38] sm:$0xff]  }
   0x4   :  { %v53_v12 = vmul.f32 %v228_v2, %v338_v1  ;;  %v54_v13 = vmul.f32 %v229_v3, %v338_v1  ;;  %v55_v16 = vmul.f32 %v232_v8, %v338_v1  ;;  %v56_v17 = vmul.f32 %v233_v9, %v338_v1  ;;  %v301_v28 = vld [vmem:[%s422_s0 + $0x20] sm:$0xff]  }
   0x5   :  { %v57_v18 = vmul.f32 %v236_v10, %v338_v1  ;;  %v58_v19 = vmul.f32 %v237_v11, %v338_v1  ;;  %v59_v22 = vmul.f32 %v240_v14, %v338_v1  ;;  %v60_v23 = vmul.f32 %v241_v15, %v338_v1 }
   0x6   :  { %v76_v20 = vadd.f32 %v352_v7, %v53_v12  ;;  %v77_v21 = vadd.f32 %v352_v7, %v54_v13  ;;  %v78_v24 = vadd.f32 %v352_v7, %v55_v16  ;;  %v79_v25 = vadd.f32 %v352_v7, %v56_v17 }
   0x7   :  { %v80_v26 = vadd.f32 %v352_v7, %v57_v18  ;;  %v81_v27 = vadd.f32 %v352_v7, %v58_v19  ;;  %v82_v31 = vadd.f32 %v352_v7, %v59_v22  ;;  %v83_v32 = vadd.f32 %v352_v7, %v60_v23 }
   0x8   :  { %v92_v29 = vmax.f32 %v76_v20, 0.0  ;;  %v93_v30 = vmax.f32 %v77_v21, 0.0  ;;  %v94_v34 = vmax.f32 %v78_v24, 0.0  ;;  %v95_v35 = vmax.f32 %v79_v25, 0.0 }
   0x9   :  { %v96_v36 = vmax.f32 %v80_v26, 0.0  ;;  %v97_v37 = vmax.f32 %v81_v27, 0.0  ;;  %v98_v40 = vmax.f32 %v82_v31, 0.0  ;;  %v99_v41 = vmax.f32 %v83_v32, 0.0 }
   0xa   :  { %v261_v39 = vpack.c.bf16 %v93_v30, %v92_v29  ;;  %v244_v42 = vunpack.c.l.bf16 %v301_v28  ;;  %v266_v44 = vpack.c.bf16 %v95_v35, %v94_v34  ;;  %v245_v46 = vunpack.c.h.bf16 %v301_v28 }
   0xb   :  { %v271_v45 = vpack.c.bf16 %v97_v37, %v96_v36  ;;  %v248_v47 = vunpack.c.l.bf16 %v302_v33  ;;  %v276_v48 = vpack.c.bf16 %v99_v41, %v98_v40  ;;  %v249_v50 = vunpack.c.h.bf16 %v302_v33 }
   0xc   :  { %262 = vst [vmem:[%s425_s3] sm:$0xff] %v261_v39   ;;  %v61_v49 = vmul.f32 %v244_v42, %v338_v1  ;;  %v252_v51 = vunpack.c.l.bf16 %v303_v38  ;;  %305 = vst [vmem:[%s425_s3 + $0x8] sm:$0xff] %v266_v44   ;;  %v62_v52 = vmul.f32 %v245_v46, %v338_v1  ;;  %v253_v54 = vunpack.c.h.bf16 %v303_v38 }
   0xd   :  { %306 = vst [vmem:[%s425_s3 + $0x10] sm:$0xff] %v271_v45   ;;  %v63_v53 = vmul.f32 %v248_v47, %v338_v1  ;;  %v256_v55 = vunpack.c.l.bf16 %v304_v43  ;;  %307 = vst [vmem:[%s425_s3 + $0x18] sm:$0xff] %v276_v48   ;;  %v64_v57 = vmul.f32 %v249_v50, %v338_v1  ;;  %v257_v59 = vunpack.c.h.bf16 %v304_v43 }
   0xe   :  { %v84_v56 = vadd.f32 %v352_v7, %v61_v49  ;;  %v65_v58 = vmul.f32 %v252_v51, %v338_v1  ;;  %v85_v60 = vadd.f32 %v352_v7, %v62_v52  ;;  %v66_v62 = vmul.f32 %v253_v54, %v338_v1 }
   0xf   :  { %v86_v61 = vadd.f32 %v352_v7, %v63_v53  ;;  %v67_v63 = vmul.f32 %v256_v55, %v338_v1  ;;  %v87_v2 = vadd.f32 %v352_v7, %v64_v57  ;;  %v68_v4 = vmul.f32 %v257_v59, %v338_v1 }
  0x10   :  { %v100_v0 = vmax.f32 %v84_v56, 0.0  ;;  %v88_v3 = vadd.f32 %v352_v7, %v65_v58  ;;  %v101_v5 = vmax.f32 %v85_v60, 0.0  ;;  %v89_v8 = vadd.f32 %v352_v7, %v66_v62 }
  0x11   :  { %v102_v6 = vmax.f32 %v86_v61, 0.0  ;;  %v90_v9 = vadd.f32 %v352_v7, %v67_v63  ;;  %v103_v10 = vmax.f32 %v87_v2, 0.0  ;;  %v91_v12 = vadd.f32 %v352_v7, %v68_v4 }
  0x12   :  { %v104_v11 = vmax.f32 %v88_v3, 0.0  ;;  %v281_v13 = vpack.c.bf16 %v101_v5, %v100_v0  ;;  %v105_v14 = vmax.f32 %v89_v8, 0.0 }
  0x13   :  { %v106_v15 = vmax.f32 %v90_v9, 0.0  ;;  %v286_v16 = vpack.c.bf16 %v103_v10, %v102_v6  ;;  %v107_v17 = vmax.f32 %v91_v12, 0.0 }
  0x14   :  { %308 = vst [vmem:[%s425_s3 + $0x20] sm:$0xff] %v281_v13   ;;  %v291_v1 = vpack.c.bf16 %v105_v14, %v104_v11 }
  0x15   :  { %309 = vst [vmem:[%s425_s3 + $0x28] sm:$0xff] %v286_v16   ;;  %v296_v18 = vpack.c.bf16 %v107_v17, %v106_v15 }
  0x16   :  { %310 = vst [vmem:[%s425_s3 + $0x30] sm:$0xff] %v291_v1  }
  0x17   :  { %311 = vst [vmem:[%s425_s3 + $0x38] sm:$0xff] %v296_v18  }

// kernel: basic_block_forward.5
= control target key start
LH: loop header
LB: loop body
LE: loop exit
PB: predicated region body
PF: predicated region fallthrough
CT: control target
= control target key end

     0   :  { %s686_s1 = inlined_call_operand.vmem [shape: bf16[128,128], index: 1, kind: input, shape index: {}]   ;;  %s687_s0 = inlined_call_operand.vmem [shape: bf16[128,128], index: 0, kind: input, shape index: {}]   ;;  %s688_s2 = inlined_call_operand.vmem [shape: bf16[128,128], index: 2, kind: output, shape index: {0}]   ;;  %s689_s3 = inlined_call_operand.vmem [shape: f32[8,128], index: 3, kind: output, shape index: {1}]   ;;  %s690_s4 = inlined_call_operand.vmem [shape: f32[8,128], index: 4, kind: output, shape index: {2}]  }
   0x1   :  { %v567_v0 = vld [vmem:[%s686_s1] sm:$0xff]   ;;  %v568_v1 = vld [vmem:[%s686_s1 + $0x8] sm:$0xff]   ;;  %v569_v2 = vld [vmem:[%s686_s1 + $0x10] sm:$0xff]  }
   0x2   :  { %519 = vmatprep.subr.bf16.mxu0 %v567_v0  ;;  %551 = vmatprep.subr.bf16.mxu1 %v567_v0  ;;  %v570_v3 = vld [vmem:[%s686_s1 + $0x18] sm:$0xff]   ;;  %v575_v4 = vld [vmem:[%s687_s0] sm:$0xff]   ;;  %v572_v7 = vld [vmem:[%s686_s1 + $0x28] sm:$0xff]  }
   0x3   :  { %520 = vmatpush3.bf16.msra.mxu0 %v567_v0  ;;  %559 = vmatpush3.bf16.msra.mxu1 %v567_v0  ;;  %v571_v5 = vld [vmem:[%s686_s1 + $0x20] sm:$0xff]   ;;  %v573_v8 = vld [vmem:[%s686_s1 + $0x30] sm:$0xff]   ;;  %v574_v9 = vld [vmem:[%s686_s1 + $0x38] sm:$0xff]  }
   0x4   :  { %521 = vmatprep.subr.bf16.mxu0 %v568_v1  ;;  %552 = vmatprep.subr.bf16.mxu1 %v568_v1  ;;  %v579_v6 = vld [vmem:[%s687_s0 + $0x20] sm:$0xff]   ;;  %v576_v10 = vld [vmem:[%s687_s0 + $0x8] sm:$0xff]   ;;  %v577_v12 = vld [vmem:[%s687_s0 + $0x10] sm:$0xff]  }
   0x5   :  { %535 = vmatprep.mubr.bf16.mxu0 %v575_v4  ;;  %543 = vmatprep.mubr.bf16.mxu1 %v579_v6  ;;  %v580_v11 = vld [vmem:[%s687_s0 + $0x28] sm:$0xff]   ;;  %v581_v13 = vld [vmem:[%s687_s0 + $0x30] sm:$0xff]   ;;  %v578_v14 = vld [vmem:[%s687_s0 + $0x18] sm:$0xff]  }
   0x6   :  { %v582_v15 = vld [vmem:[%s687_s0 + $0x38] sm:$0xff]  }
   0x7   :  { %522 = vmatpush3.bf16.msra.mxu0 %v568_v1  ;;  %560 = vmatpush3.bf16.msra.mxu1 %v568_v1 }
   0x8   :  { %523 = vmatprep.subr.bf16.mxu0 %v569_v2  ;;  %553 = vmatprep.subr.bf16.mxu1 %v569_v2 }
   0xb   :  { %524 = vmatpush3.bf16.msra.mxu0 %v569_v2  ;;  %561 = vmatpush3.bf16.msra.mxu1 %v569_v2 }
   0xc   :  { %525 = vmatprep.subr.bf16.mxu0 %v570_v3  ;;  %554 = vmatprep.subr.bf16.mxu1 %v570_v3 }
   0xf   :  { %526 = vmatpush3.bf16.msra.mxu0 %v570_v3  ;;  %562 = vmatpush3.bf16.msra.mxu1 %v570_v3 }
  0x10   :  { %527 = vmatprep.subr.bf16.mxu0 %v571_v5  ;;  %555 = vmatprep.subr.bf16.mxu1 %v571_v5 }
  0x13   :  { %528 = vmatpush3.bf16.msra.mxu0 %v571_v5  ;;  %563 = vmatpush3.bf16.msra.mxu1 %v571_v5 }
  0x14   :  { %529 = vmatprep.subr.bf16.mxu0 %v572_v7  ;;  %556 = vmatprep.subr.bf16.mxu1 %v572_v7 }
  0x17   :  { %530 = vmatpush3.bf16.msra.mxu0 %v572_v7  ;;  %564 = vmatpush3.bf16.msra.mxu1 %v572_v7 }
  0x18   :  { %531 = vmatprep.subr.bf16.mxu0 %v573_v8  ;;  %557 = vmatprep.subr.bf16.mxu1 %v573_v8 }
  0x1b   :  { %532 = vmatpush3.bf16.msra.mxu0 %v573_v8  ;;  %565 = vmatpush3.bf16.msra.mxu1 %v573_v8 }
  0x1c   :  { %533 = vmatprep.subr.bf16.mxu0 %v574_v9  ;;  %558 = vmatprep.subr.bf16.mxu1 %v574_v9 }
  0x1f   :  { %534 = vmatpush3.bf16.msra.mxu0 %v574_v9  ;;  %566 = vmatpush3.bf16.msra.mxu1 %v574_v9 }
  0x22   :  { %536 = vmatmul.mubr.bf16.vlgmr.msra.gmra.mrb[0].mxu0 %v576_v10  ;;  %544 = vmatmul.mubr.bf16.vlgmr.msra.gmra.mrb[0].mxu1 %v580_v11 }
  0x23   :  { %539 = vmatprep.mubr.bf16.mxu0 %v577_v12  ;;  %547 = vmatprep.mubr.bf16.mxu1 %v581_v13 }
  0x2a   :  { %540 = vmatmul.mubr.bf16.gmra.mrb[4].mxu0 %v578_v14  ;;  %548 = vmatmul.mubr.bf16.gmra.mrb[4].mxu1 %v582_v15 }
  0xf5   :  { %v537_v16 = vpop.f32.mrb[0].mxu0  ;;  %v545_v17 = vpop.f32.mrb[0].mxu1 }
  0xf6   :  { %v177_v18 = vpop.f32.mrb[1].mxu0  ;;  %v209_v19 = vpop.f32.mrb[1].mxu1 }
  0xf7   :  { %v538_v20 = vpop.f32.mrb[2].mxu0  ;;  %v546_v21 = vpop.f32.mrb[2].mxu1 }
  0xf8   :  { %v241_v22 = vpack.c.bf16 %v538_v20, %v537_v16  ;;  %v180_v23 = vpop.f32.mrb[3].mxu0  ;;  %v245_v24 = vpack.c.bf16 %v546_v21, %v545_v17  ;;  %v212_v25 = vpop.f32.mrb[3].mxu1 }
  0xf9   :  { %v240_v26 = vpack.c.bf16 %v180_v23, %v177_v18  ;;  %v244_v27 = vpack.c.bf16 %v212_v25, %v209_v19 }
  0xfa   :  { %496 = vst [vmem:[%s688_s2 + $0x8] sm:$0xff] %v241_v22   ;;  %500 = vst [vmem:[%s688_s2 + $0x28] sm:$0xff] %v245_v24   ;;  %v322_v28 = vunpack.c.l.bf16 %v241_v22  ;;  %v323_v31 = vunpack.c.h.bf16 %v241_v22  ;;  %v330_v7 = vunpack.c.l.bf16 %v245_v24  ;;  %v331_v11 = vunpack.c.h.bf16 %v245_v24 }
  0xfb   :  { %460 = vst [vmem:[%s688_s2] sm:$0xff] %v240_v26   ;;  %v320_v29 = vunpack.c.l.bf16 %v240_v26  ;;  %v321_v30 = vunpack.c.h.bf16 %v240_v26  ;;  %499 = vst [vmem:[%s688_s2 + $0x20] sm:$0xff] %v244_v27   ;;  %v328_v2 = vunpack.c.l.bf16 %v244_v27  ;;  %v329_v5 = vunpack.c.h.bf16 %v244_v27 }
  0xfc   :  { %v360_v39 = vmul.f32 %v322_v28, %v322_v28  ;;  %v361_v44 = vmul.f32 %v323_v31, %v323_v31  ;;  %v368_v15 = vmul.f32 %v330_v7, %v330_v7  ;;  %v369_v19 = vmul.f32 %v331_v11, %v331_v11 }
  0xfd   :  { %v336_v32 = vadd.f32 %v321_v30, %v320_v29  ;;  %v358_v33 = vmul.f32 %v320_v29, %v320_v29  ;;  %v359_v34 = vmul.f32 %v321_v30, %v321_v30  ;;  %v541_v35 = vpop.f32.mrb[4].mxu0  ;;  %v549_v36 = vpop.f32.mrb[4].mxu1  ;;  %v366_v9 = vmul.f32 %v328_v2, %v328_v2 }
  0xfe   :  { %v193_v37 = vpop.f32.mrb[5].mxu0  ;;  %v225_v38 = vpop.f32.mrb[5].mxu1  ;;  %v367_v13 = vmul.f32 %v329_v5, %v329_v5 }
  0xff   :  { %v337_v40 = vadd.f32 %v336_v32, %v322_v28  ;;  %v374_v41 = vadd.f32 %v359_v34, %v358_v33  ;;  %v542_v42 = vpop.f32.mrb[6].mxu0  ;;  %v550_v43 = vpop.f32.mrb[6].mxu1 }
 0x100   :  { %v243_v45 = vpack.c.bf16 %v542_v42, %v541_v35  ;;  %v196_v46 = vpop.f32.mrb[7].mxu0  ;;  %v247_v47 = vpack.c.bf16 %v550_v43, %v549_v36  ;;  %v228_v48 = vpop.f32.mrb[7].mxu1 }
 0x101   :  { %v375_v49 = vadd.f32 %v374_v41, %v360_v39  ;;  %v242_v50 = vpack.c.bf16 %v196_v46, %v193_v37  ;;  %v338_v51 = vadd.f32 %v337_v40, %v323_v31  ;;  %v246_v52 = vpack.c.bf16 %v228_v48, %v225_v38 }
 0x102   :  { %498 = vst [vmem:[%s688_s2 + $0x18] sm:$0xff] %v243_v45   ;;  %502 = vst [vmem:[%s688_s2 + $0x38] sm:$0xff] %v247_v47   ;;  %v326_v56 = vunpack.c.l.bf16 %v243_v45  ;;  %v327_v59 = vunpack.c.h.bf16 %v243_v45  ;;  %v334_v23 = vunpack.c.l.bf16 %v247_v47  ;;  %v335_v28 = vunpack.c.h.bf16 %v247_v47 }
 0x103   :  { %497 = vst [vmem:[%s688_s2 + $0x10] sm:$0xff] %v242_v50   ;;  %v324_v53 = vunpack.c.l.bf16 %v242_v50  ;;  %v325_v54 = vunpack.c.h.bf16 %v242_v50  ;;  %v376_v55 = vadd.f32 %v375_v49, %v361_v44  ;;  %501 = vst [vmem:[%s688_s2 + $0x30] sm:$0xff] %v246_v52   ;;  %v332_v18 = vunpack.c.l.bf16 %v246_v52 }
 0x104   :  { %v364_v63 = vmul.f32 %v326_v56, %v326_v56  ;;  %v365_v3 = vmul.f32 %v327_v59, %v327_v59  ;;  %v333_v21 = vunpack.c.h.bf16 %v246_v52  ;;  %v372_v24 = vmul.f32 %v334_v23, %v334_v23 }
 0x105   :  { %v339_v57 = vadd.f32 %v338_v51, %v324_v53  ;;  %v362_v58 = vmul.f32 %v324_v53, %v324_v53  ;;  %v363_v61 = vmul.f32 %v325_v54, %v325_v54  ;;  %v370_v26 = vmul.f32 %v332_v18, %v332_v18 }
 0x106   :  { %v371_v30 = vmul.f32 %v333_v21, %v333_v21  ;;  %v373_v34 = vmul.f32 %v335_v28, %v335_v28 }
 0x107   :  { %v340_v60 = vadd.f32 %v339_v57, %v325_v54  ;;  %v377_v62 = vadd.f32 %v376_v55, %v362_v58 }
 0x109   :  { %v341_v0 = vadd.f32 %v340_v60, %v326_v56  ;;  %v378_v1 = vadd.f32 %v377_v62, %v363_v61 }
 0x10b   :  { %v379_v4 = vadd.f32 %v378_v1, %v364_v63  ;;  %v342_v6 = vadd.f32 %v341_v0, %v327_v59 }
 0x10d   :  { %v343_v8 = vadd.f32 %v342_v6, %v328_v2  ;;  %v380_v10 = vadd.f32 %v379_v4, %v365_v3 }
 0x10f   :  { %v344_v12 = vadd.f32 %v343_v8, %v329_v5  ;;  %v381_v14 = vadd.f32 %v380_v10, %v366_v9 }
 0x111   :  { %v345_v16 = vadd.f32 %v344_v12, %v330_v7  ;;  %v382_v17 = vadd.f32 %v381_v14, %v367_v13 }
 0x113   :  { %v383_v20 = vadd.f32 %v382_v17, %v368_v15  ;;  %v346_v22 = vadd.f32 %v345_v16, %v331_v11 }
 0x115   :  { %v347_v25 = vadd.f32 %v346_v22, %v332_v18  ;;  %v384_v27 = vadd.f32 %v383_v20, %v369_v19 }
 0x117   :  { %v348_v29 = vadd.f32 %v347_v25, %v333_v21  ;;  %v385_v31 = vadd.f32 %v384_v27, %v370_v26 }
 0x119   :  { %v349_v32 = vadd.f32 %v348_v29, %v334_v23  ;;  %v386_v33 = vadd.f32 %v385_v31, %v371_v30 }
 0x11b   :  { %v350_v35 = vadd.f32 %v349_v32, %v335_v28  ;;  %v387_v36 = vadd.f32 %v386_v33, %v372_v24 }
 0x11d   :  { %v351_v37 = vrot.slane %v350_v35, 4  ;;  %v388_v38 = vadd.f32 %v387_v36, %v373_v34 }
 0x11f   :  { %v352_v39 = vadd.f32 %v351_v37, %v350_v35  ;;  %v389_v40 = vrot.slane %v388_v38, 4 }
 0x121   :  { %v353_v41 = vrot.slane %v352_v39, 2  ;;  %v390_v42 = vadd.f32 %v389_v40, %v388_v38 }
 0x123   :  { %v354_v43 = vadd.f32 %v353_v41, %v352_v39  ;;  %v391_v44 = vrot.slane %v390_v42, 2 }
 0x125   :  { %v355_v45 = vrot.slane %v354_v43, 1  ;;  %v392_v46 = vadd.f32 %v391_v44, %v390_v42 }
 0x127   :  { %v356_v47 = vadd.f32 %v355_v45, %v354_v43  ;;  %v393_v48 = vrot.slane %v392_v46, 1 }
 0x129   :  { %357 = vst [vmem:[%s689_s3] sm:$0xff] %v356_v47  ;;  %v394_v49 = vadd.f32 %v393_v48, %v392_v46 }
 0x12b   :  { %395 = vst [vmem:[%s690_s4] sm:$0xff] %v394_v49 }

// kernel: basic_block_forward.9
= control target key start
LH: loop header
LB: loop body
LE: loop exit
PB: predicated region body
PF: predicated region fallthrough
CT: control target
= control target key end

     0   :  { %s528_s0 = inlined_call_operand.vmem [shape: bf16[128,128], index: 0, kind: input, shape index: {}]   ;;  %s529_s1 = inlined_call_operand.vmem [shape: bf16[128,128], index: 1, kind: input, shape index: {}]   ;;  %s530_s2 = inlined_call_operand.vmem [shape: f32[1,128], index: 2, kind: input, shape index: {}]   ;;  %s531_s3 = inlined_call_operand.vmem [shape: f32[1,128], index: 3, kind: input, shape index: {}]   ;;  %s532_s4 = inlined_call_operand.vmem [shape: f32[1,128], index: 4, kind: input, shape index: {}]   ;;  %s533_s5 = inlined_call_operand.vmem [shape: f32[1,128], index: 5, kind: input, shape index: {}]   ;;  %s534_s6 = inlined_call_operand.vmem [shape: f32[128,128], index: 6, kind: output, shape index: {}]  }
   0x1   :  { %v236_v0 = vld [vmem:[%s528_s0] sm:$0xff]   ;;  %v299_v9 = vld [vmem:[%s528_s0 + $0x8] sm:$0xff]   ;;  %v300_v20 = vld [vmem:[%s528_s0 + $0x10] sm:$0xff]  }
   0x2   :  { %v354_v1 = vld [vmem:[%s530_s2] ss:$0 sm:$0xff]  ;;  %v237_v2 = vunpack.c.l.bf16 %v236_v0  ;;  %v238_v5 = vunpack.c.h.bf16 %v236_v0  ;;  %v306_v10 = vld [vmem:[%s529_s1 + $0x8] sm:$0xff]   ;;  %v241_v14 = vunpack.c.l.bf16 %v299_v9  ;;  %v242_v18 = vunpack.c.h.bf16 %v299_v9  ;;  %v307_v21 = vld [vmem:[%s529_s1 + $0x10] sm:$0xff]  }
   0x3   :  { %v268_v3 = vld [vmem:[%s529_s1] sm:$0xff]   ;;  %v273_v15 = vunpack.c.l.bf16 %v306_v10  ;;  %v274_v19 = vunpack.c.h.bf16 %v306_v10  ;;  %v245_v32 = vunpack.c.l.bf16 %v300_v20  ;;  %v277_v33 = vunpack.c.l.bf16 %v307_v21  ;;  %v301_v42 = vld [vmem:[%s528_s0 + $0x18] sm:$0xff]  }
   0x4   :  { %v362_v4 = vld [vmem:[%s532_s4] ss:$0 sm:$0xff]  ;;  %v269_v7 = vunpack.c.l.bf16 %v268_v3  ;;  %v270_v8 = vunpack.c.h.bf16 %v268_v3  ;;  %v62_v11 = vmul.f32 %v237_v2, %v354_v1  ;;  %v63_v13 = vmul.f32 %v238_v5, %v354_v1  ;;  %v308_v43 = vld [vmem:[%s529_s1 + $0x18] sm:$0xff]  }
   0x5   :  { %v367_v6 = vld [vmem:[%s531_s3] ss:$0 sm:$0xff]  ;;  %v64_v24 = vmul.f32 %v241_v14, %v354_v1  ;;  %v142_v25 = vmul.f32 %v273_v15, %v362_v4  ;;  %v65_v28 = vmul.f32 %v242_v18, %v354_v1  ;;  %v143_v29 = vmul.f32 %v274_v19, %v362_v4  ;;  %v303_v14 = vld [vmem:[%s528_s0 + $0x28] sm:$0xff]  }
   0x6   :  { %v379_v12 = vld [vmem:[%s533_s5] ss:$0 sm:$0xff]  ;;  %v140_v16 = vmul.f32 %v269_v7, %v362_v4  ;;  %v141_v17 = vmul.f32 %v270_v8, %v362_v4  ;;  %v85_v22 = vadd.f32 %v367_v6, %v62_v11  ;;  %v86_v23 = vadd.f32 %v367_v6, %v63_v13  ;;  %v310_v19 = vld [vmem:[%s529_s1 + $0x28] sm:$0xff]  }
   0x7   :  { %v87_v30 = vadd.f32 %v367_v6, %v64_v24  ;;  %v165_v31 = vadd.f32 %v379_v12, %v142_v25  ;;  %v88_v36 = vadd.f32 %v367_v6, %v65_v28  ;;  %v166_v37 = vadd.f32 %v379_v12, %v143_v29  ;;  %v302_v52 = vld [vmem:[%s528_s0 + $0x20] sm:$0xff]  }
   0x8   :  { %v163_v26 = vadd.f32 %v379_v12, %v140_v16  ;;  %v164_v27 = vadd.f32 %v379_v12, %v141_v17  ;;  %v66_v39 = vmul.f32 %v245_v32, %v354_v1  ;;  %v144_v40 = vmul.f32 %v277_v33, %v362_v4  ;;  %v309_v57 = vld [vmem:[%s529_s1 + $0x20] sm:$0xff]   ;;  %v304_v32 = vld [vmem:[%s528_s0 + $0x30] sm:$0xff]  }
   0x9   :  { %v181_v38 = vadd.f32 %v165_v31, %v87_v30  ;;  %v246_v41 = vunpack.c.h.bf16 %v300_v20  ;;  %v182_v46 = vadd.f32 %v166_v37, %v88_v36  ;;  %v278_v47 = vunpack.c.h.bf16 %v307_v21  ;;  %v311_v33 = vld [vmem:[%s529_s1 + $0x30] sm:$0xff]  }
   0xa   :  { %v179_v34 = vadd.f32 %v163_v26, %v85_v22  ;;  %v180_v35 = vadd.f32 %v164_v27, %v86_v23  ;;  %v89_v49 = vadd.f32 %v367_v6, %v66_v39  ;;  %v167_v50 = vadd.f32 %v379_v12, %v144_v40 }
   0xb   :  { %v197_v48 = vmax.f32 %v181_v38, 0.0  ;;  %v67_v51 = vmul.f32 %v246_v41, %v354_v1  ;;  %v198_v53 = vmax.f32 %v182_v46, 0.0  ;;  %v145_v54 = vmul.f32 %v278_v47, %v362_v4  ;;  %v305_v46 = vld [vmem:[%s528_s0 + $0x38] sm:$0xff]  }
   0xc   :  { %v195_v44 = vmax.f32 %v179_v34, 0.0  ;;  %v196_v45 = vmax.f32 %v180_v35, 0.0  ;;  %v249_v55 = vunpack.c.l.bf16 %v301_v42  ;;  %v281_v56 = vunpack.c.l.bf16 %v308_v43 }
   0xd   :  { %213 = vst [vmem:[%s534_s6 + $0x10] sm:$0xff] %v197_v48  ;;  %v183_v58 = vadd.f32 %v167_v50, %v89_v49  ;;  %v90_v59 = vadd.f32 %v367_v6, %v67_v51  ;;  %v250_v60 = vunpack.c.h.bf16 %v301_v42  ;;  %v282_v61 = vunpack.c.h.bf16 %v308_v43  ;;  %214 = vst [vmem:[%s534_s6 + $0x18] sm:$0xff] %v198_v53 }
   0xe   :  { %211 = vst [vmem:[%s534_s6] sm:$0xff] %v195_v44  ;;  %212 = vst [vmem:[%s534_s6 + $0x8] sm:$0xff] %v196_v45  ;;  %v168_v62 = vadd.f32 %v379_v12, %v145_v54  ;;  %v68_v63 = vmul.f32 %v249_v55, %v354_v1  ;;  %v146_v0 = vmul.f32 %v281_v56, %v362_v4  ;;  %v253_v2 = vunpack.c.l.bf16 %v302_v52  ;;  %v312_v55 = vld [vmem:[%s529_s1 + $0x38] sm:$0xff]  }
   0xf   :  { %v199_v3 = vmax.f32 %v183_v58, 0.0  ;;  %v69_v5 = vmul.f32 %v250_v60, %v354_v1  ;;  %v147_v7 = vmul.f32 %v282_v61, %v362_v4  ;;  %v285_v8 = vunpack.c.l.bf16 %v309_v57 }
  0x10   :  { %v184_v9 = vadd.f32 %v168_v62, %v90_v59  ;;  %v91_v10 = vadd.f32 %v367_v6, %v68_v63  ;;  %v169_v11 = vadd.f32 %v379_v12, %v146_v0  ;;  %v70_v13 = vmul.f32 %v253_v2, %v354_v1 }
  0x11   :  { %215 = vst [vmem:[%s534_s6 + $0x20] sm:$0xff] %v199_v3  ;;  %v92_v15 = vadd.f32 %v367_v6, %v69_v5  ;;  %v170_v16 = vadd.f32 %v379_v12, %v147_v7  ;;  %v148_v17 = vmul.f32 %v285_v8, %v362_v4  ;;  %v254_v18 = vunpack.c.h.bf16 %v302_v52 }
  0x12   :  { %v200_v20 = vmax.f32 %v184_v9, 0.0  ;;  %v185_v21 = vadd.f32 %v169_v11, %v91_v10  ;;  %v93_v22 = vadd.f32 %v367_v6, %v70_v13  ;;  %v286_v23 = vunpack.c.h.bf16 %v309_v57 }
  0x13   :  { %v186_v24 = vadd.f32 %v170_v16, %v92_v15  ;;  %v171_v25 = vadd.f32 %v379_v12, %v148_v17  ;;  %v71_v26 = vmul.f32 %v254_v18, %v354_v1  ;;  %v257_v27 = vunpack.c.l.bf16 %v303_v14 }
  0x14   :  { %216 = vst [vmem:[%s534_s6 + $0x28] sm:$0xff] %v200_v20  ;;  %v201_v28 = vmax.f32 %v185_v21, 0.0  ;;  %v149_v29 = vmul.f32 %v286_v23, %v362_v4  ;;  %v289_v30 = vunpack.c.l.bf16 %v310_v19  ;;  %v258_v31 = vunpack.c.h.bf16 %v303_v14 }
  0x15   :  { %v202_v34 = vmax.f32 %v186_v24, 0.0  ;;  %v187_v35 = vadd.f32 %v171_v25, %v93_v22  ;;  %v94_v36 = vadd.f32 %v367_v6, %v71_v26  ;;  %v72_v37 = vmul.f32 %v257_v27, %v354_v1 }
  0x16   :  { %217 = vst [vmem:[%s534_s6 + $0x30] sm:$0xff] %v201_v28  ;;  %v172_v38 = vadd.f32 %v379_v12, %v149_v29  ;;  %v150_v39 = vmul.f32 %v289_v30, %v362_v4  ;;  %v73_v40 = vmul.f32 %v258_v31, %v354_v1  ;;  %v290_v41 = vunpack.c.h.bf16 %v310_v19 }
  0x17   :  { %218 = vst [vmem:[%s534_s6 + $0x38] sm:$0xff] %v202_v34  ;;  %v203_v42 = vmax.f32 %v187_v35, 0.0  ;;  %v95_v43 = vadd.f32 %v367_v6, %v72_v37  ;;  %v261_v44 = vunpack.c.l.bf16 %v304_v32  ;;  %v293_v45 = vunpack.c.l.bf16 %v311_v33 }
  0x18   :  { %v188_v47 = vadd.f32 %v172_v38, %v94_v36  ;;  %v173_v48 = vadd.f32 %v379_v12, %v150_v39  ;;  %v96_v49 = vadd.f32 %v367_v6, %v73_v40  ;;  %v151_v50 = vmul.f32 %v290_v41, %v362_v4 }
  0x19   :  { %219 = vst [vmem:[%s534_s6 + $0x40] sm:$0xff] %v203_v42  ;;  %v74_v51 = vmul.f32 %v261_v44, %v354_v1  ;;  %v152_v52 = vmul.f32 %v293_v45, %v362_v4  ;;  %v262_v53 = vunpack.c.h.bf16 %v304_v32  ;;  %v294_v54 = vunpack.c.h.bf16 %v311_v33 }
  0x1a   :  { %v204_v56 = vmax.f32 %v188_v47, 0.0  ;;  %v189_v57 = vadd.f32 %v173_v48, %v95_v43  ;;  %v174_v58 = vadd.f32 %v379_v12, %v151_v50  ;;  %v265_v59 = vunpack.c.l.bf16 %v305_v46 }
  0x1b   :  { %v97_v60 = vadd.f32 %v367_v6, %v74_v51  ;;  %v175_v61 = vadd.f32 %v379_v12, %v152_v52  ;;  %v75_v62 = vmul.f32 %v262_v53, %v354_v1  ;;  %v153_v63 = vmul.f32 %v294_v54, %v362_v4 }
  0x1c   :  { %220 = vst [vmem:[%s534_s6 + $0x48] sm:$0xff] %v204_v56  ;;  %v205_v0 = vmax.f32 %v189_v57, 0.0  ;;  %v190_v2 = vadd.f32 %v174_v58, %v96_v49  ;;  %v76_v3 = vmul.f32 %v265_v59, %v354_v1  ;;  %v297_v5 = vunpack.c.l.bf16 %v312_v55 }
  0x1d   :  { %v191_v7 = vadd.f32 %v175_v61, %v97_v60  ;;  %v98_v8 = vadd.f32 %v367_v6, %v75_v62  ;;  %v176_v9 = vadd.f32 %v379_v12, %v153_v63  ;;  %v266_v10 = vunpack.c.h.bf16 %v305_v46 }
  0x1e   :  { %221 = vst [vmem:[%s534_s6 + $0x50] sm:$0xff] %v205_v0  ;;  %v206_v11 = vmax.f32 %v190_v2, 0.0  ;;  %v99_v13 = vadd.f32 %v367_v6, %v76_v3  ;;  %v154_v14 = vmul.f32 %v297_v5, %v362_v4  ;;  %v298_v15 = vunpack.c.h.bf16 %v312_v55 }
  0x1f   :  { %v207_v16 = vmax.f32 %v191_v7, 0.0  ;;  %v192_v17 = vadd.f32 %v176_v9, %v98_v8  ;;  %v77_v18 = vmul.f32 %v266_v10, %v354_v1 }
  0x20   :  { %222 = vst [vmem:[%s534_s6 + $0x58] sm:$0xff] %v206_v11  ;;  %v177_v19 = vadd.f32 %v379_v12, %v154_v14  ;;  %v155_v20 = vmul.f32 %v298_v15, %v362_v4 }
  0x21   :  { %223 = vst [vmem:[%s534_s6 + $0x60] sm:$0xff] %v207_v16  ;;  %v208_v21 = vmax.f32 %v192_v17, 0.0  ;;  %v100_v22 = vadd.f32 %v367_v6, %v77_v18 }
  0x22   :  { %v193_v23 = vadd.f32 %v177_v19, %v99_v13  ;;  %v178_v24 = vadd.f32 %v379_v12, %v155_v20 }
  0x23   :  { %224 = vst [vmem:[%s534_s6 + $0x68] sm:$0xff] %v208_v21 }
  0x24   :  { %v209_v1 = vmax.f32 %v193_v23, 0.0  ;;  %v194_v25 = vadd.f32 %v178_v24, %v100_v22 }
  0x26   :  { %225 = vst [vmem:[%s534_s6 + $0x70] sm:$0xff] %v209_v1  ;;  %v210_v4 = vmax.f32 %v194_v25, 0.0 }
  0x28   :  { %226 = vst [vmem:[%s534_s6 + $0x78] sm:$0xff] %v210_v4 }

</bundles_post_ra>
